<compile_context>
chip_gen: v7x
topology: tpu7x:2x2x1
jax: 0.10.0
libtpu: 0.0.40
codegen_flags: <defaults>
</compile_context>

<pallas_src>
import functools

import jax
import jax.numpy as jnp
from jax import lax
from jax.experimental import pallas as pl
from jax.experimental.pallas import tpu as pltpu

GAMMA = 2.0
ALPHA = 0.25
EPSILON = 1e-09

LANES = 128
SUBLANES = 8
MAX_ROW_TILE = 4096   # (4096, 128) f32 = 2 MiB per input block
NUM_PARTS = 2         # leading "parallel" axis -> both v7x TensorCores


def _elementwise_loss(x, t, *, gamma, alpha, eps):
    """Per-element binary focal loss in f32; VPU-only pow for small int gamma."""
    omx = 1.0 - x
    log_x = jnp.log(x + eps)
    log_omx = jnp.log(omx + eps)     # reuse omx (saves one VALU op/elem)

    if gamma == 2.0:                               # default: plain squaring
        pow_omx = omx * omx
        pow_x = x * x
    elif gamma == float(int(gamma)) and 0 <= int(gamma) <= 4:
        g = int(gamma)
        pow_omx = jnp.ones_like(x)
        pow_x = jnp.ones_like(x)
        for _ in range(g):
            pow_omx = pow_omx * omx
            pow_x = pow_x * x
    else:                                          # generic gamma (EUP pow)
        pow_omx = jnp.power(omx, gamma)
        pow_x = jnp.power(x, gamma)

    loss = (-alpha) * t * pow_omx * log_x
    loss = loss + (-(1.0 - alpha)) * (1.0 - t) * pow_x * log_omx
    return loss


def _reduce_to_block(loss, *, row_tile, acc_rows):
    """(row_tile, 128) -> (acc_rows, 128) partial sums with a short add chain."""
    groups = row_tile // acc_rows
    if groups == 1:
        return loss
    if groups % 4 == 0 and groups >= 8:
        # 4 independent accumulation chains, then a 3-add fold (hides VALU
        # add latency once row_tile is large).
        l4 = loss.reshape(4, groups // 4, acc_rows, LANES)
        return jnp.sum(jnp.sum(l4, axis=1), axis=0)
    return jnp.sum(loss.reshape(groups, acc_rows, LANES), axis=0)


def _focal_loss_kernel(x_ref, t_ref, o_ref, *, gamma, alpha, eps,
                       rows, row_tile, acc_rows, tiles_per_part, n_tiles):
    p = pl.program_id(0)   # parallel part (TensorCore shard on v7x)
    i = pl.program_id(1)   # sequential tile within the part
    block_idx = p * tiles_per_part + i

    # Output block index depends only on p, so it stays resident in VMEM
    # across the inner ("arbitrary") axis and acts as the per-part accumulator.
    @pl.when(i == 0)
    def _():
        o_ref[...] = jnp.zeros_like(o_ref)

    def accumulate(mask_rows):
        x = x_ref[...].astype(jnp.float32)
        t = t_ref[...].astype(jnp.float32)
        loss = _elementwise_loss(x, t, gamma=gamma, alpha=alpha, eps=eps)
        if mask_rows:
            # Ragged last tile: the DMA window extends past the array end, so
            # trailing rows of this block are unspecified -> select (not
            # multiply) them away before accumulating.
            row0 = block_idx * row_tile
            local_row = lax.broadcasted_iota(jnp.int32, (row_tile, LANES), 0)
            loss = jnp.where(row0 + local_row < rows, loss, 0.0)
        o_ref[...] += _reduce_to_block(loss, row_tile=row_tile, acc_rows=acc_rows)

    ragged = (rows % row_tile) != 0   # static (trace-time) check

    if ragged:
        # Mask-free body for interior tiles; mask only on the last real tile;
        # duplicated (clamped) tiles past n_tiles skip compute entirely.
        @pl.when(block_idx < n_tiles - 1)
        def _():
            accumulate(mask_rows=False)

        @pl.when(block_idx == n_tiles - 1)
        def _():
            accumulate(mask_rows=True)
    else:
        @pl.when(block_idx < n_tiles)
        def _():
            accumulate(mask_rows=False)


def binary_focal_loss(x, t, *, gamma=GAMMA, alpha=ALPHA, eps=EPSILON):
    assert x.shape == t.shape
    gamma = float(gamma)   # must be a static Python scalar (not traced)
    alpha = float(alpha)
    eps = float(eps)

    count = x.size   # mean over ALL elements of the original tensor

    # Flatten to a lane-dense (rows, 128) slab; keep the caller's dtype and
    # upcast in-kernel (bf16 x / int8 t halve+ HBM traffic for free).
    x_flat = x.reshape(-1)
    t_flat = t.reshape(-1)

    chunk = SUBLANES * LANES   # 1024 elements
    padded = ((count + chunk - 1) // chunk) * chunk
    if padded != count:
        # Rare ragged tail: zero padding contributes exactly 0 loss
        # (t=0 kills term 1, x^gamma=0 kills term 2).
        # TODO(synk): a manual-DMA (pl.ANY) path could avoid this copy.
        pad = padded - count
        x_flat = jnp.pad(x_flat, (0, pad))
        t_flat = jnp.pad(t_flat, (0, pad))

    rows = padded // LANES
    x2d = x_flat.reshape(rows, LANES)
    t2d = t_flat.reshape(rows, LANES)

    row_tile = min(MAX_ROW_TILE, rows)             # rows is a multiple of 8
    acc_rows = 32 if row_tile % 32 == 0 else SUBLANES
    n_tiles = (rows + row_tile - 1) // row_tile
    num_parts = NUM_PARTS if n_tiles >= NUM_PARTS else 1
    tiles_per_part = (n_tiles + num_parts - 1) // num_parts
    last_block = n_tiles - 1

    def in_index(p, i):
        # Clamp so the DMA window never starts past the array; logically
        # out-of-range (duplicate) tiles are skipped by pl.when in the kernel.
        return (jnp.minimum(p * tiles_per_part + i, last_block), 0)

    kernel = functools.partial(
        _focal_loss_kernel,
        gamma=gamma, alpha=alpha, eps=eps,
        rows=rows, row_tile=row_tile, acc_rows=acc_rows,
        tiles_per_part=tiles_per_part, n_tiles=n_tiles,
    )

    partials = pl.pallas_call(
        kernel,
        out_shape=jax.ShapeDtypeStruct((num_parts * acc_rows, LANES), jnp.float32),
        grid_spec=pltpu.PrefetchScalarGridSpec(
            num_scalar_prefetch=0,
            grid=(num_parts, tiles_per_part),
            in_specs=[
                pl.BlockSpec((row_tile, LANES), in_index),
                pl.BlockSpec((row_tile, LANES), in_index),
            ],
            out_specs=pl.BlockSpec((acc_rows, LANES), lambda p, i: (p, 0)),
        ),
        compiler_params=pltpu.CompilerParams(
            dimension_semantics=("parallel", "arbitrary"),
        ),
    )(x2d, t2d)

    # Single tiny cross-lane reduction + mean, once, outside the kernel.
    return jnp.sum(partials) / jnp.float32(count)


def binary_focal_loss_ref(x, t, *, gamma=GAMMA, alpha=ALPHA, eps=EPSILON):
    x = x.astype(jnp.float32)
    t = t.astype(jnp.float32)
    loss = -alpha * t * jnp.power(1.0 - x, gamma) * jnp.log(x + eps)
    loss += -(1.0 - alpha) * (1.0 - t) * jnp.power(x, gamma) * jnp.log(1.0 - x + eps)
    return jnp.mean(loss)


if __name__ == "__main__":
    key = jax.random.PRNGKey(0)
    kx, kt, kx2, kt2 = jax.random.split(key, 4)

    # Small NCHW-shaped example, as the module would typically see
    # (probabilities in (0, 1), multi-hot targets).
    shape = (2, 4, 16, 16)
    x = jax.random.uniform(kx, shape, dtype=jnp.float32, minval=0.01, maxval=0.99)
    t = (jax.random.uniform(kt, shape, dtype=jnp.float32) > 0.5).astype(jnp.float32)

    out = jax.block_until_ready(binary_focal_loss(x, t))
    ref = binary_focal_loss_ref(x, t)
    assert jnp.allclose(out, ref, rtol=1e-4, atol=1e-6), (out, ref)

    # Larger, non-divisible shape: exercises multi-tile streaming, the 2-way
    # parallel axis, the ragged-last-tile mask and the duplicate-tile skip.
    shape2 = (16, 16, 64, 65)
    x2 = jax.random.uniform(kx2, shape2, dtype=jnp.float32, minval=0.01, maxval=0.99)
    t2 = (jax.random.uniform(kt2, shape2, dtype=jnp.float32) > 0.5).astype(jnp.float32)

    out2 = jax.block_until_ready(binary_focal_loss(x2, t2))
    ref2 = binary_focal_loss_ref(x2, t2)
    assert jnp.allclose(out2, ref2, rtol=1e-4, atol=1e-6), (out2, ref2)

    print("KERNEL_OK")
</pallas_src>

<mosaic_0001>
module attributes {stable_mosaic.version = 11 : i64} {
  func.func @_focal_loss_kernel(%arg0: i32, %arg1: i32, %arg2: memref<16x128xf32, #tpu.memory_space<vmem>>, %arg3: memref<16x128xf32, #tpu.memory_space<vmem>>, %arg4: memref<8x128xf32, #tpu.memory_space<vmem>>) attributes {dimension_semantics = [#tpu.dimension_semantics<parallel>, #tpu.dimension_semantics<arbitrary>], iteration_bounds = array<i64: 1, 1>, scalar_prefetch = 0 : i64, scratch_operands = 0 : i64, tpu.core_type = #tpu.core_type<tc>, window_params = [{transform_indices = @transform_0, window_bounds = array<i64: 16, 128>}, {transform_indices = @transform_1, window_bounds = array<i64: 16, 128>}, {transform_indices = @transform_2, window_bounds = array<i64: 8, 128>}]} {
    %c1_i32 = arith.constant 1 : i32
    %0 = arith.muli %arg0, %c1_i32 : i32
    %1 = arith.addi %0, %arg1 : i32
    %c0_i32 = arith.constant 0 : i32
    %2 = arith.cmpi eq, %arg1, %c0_i32 : i32
    %3 = arith.extui %2 : i1 to i32
    %c0_i32_0 = arith.constant 0 : i32
    %4 = arith.cmpi ne, %3, %c0_i32_0 : i32
    scf.if %4 {
      %cst = arith.constant 0.000000e+00 : f32
      %8 = vector.broadcast %cst : f32 to vector<8x128xf32>
      %c0 = arith.constant 0 : index
      %c0_3 = arith.constant 0 : index
      %9 = vector.load %arg4[%c0, %c0_3] : memref<8x128xf32, #tpu.memory_space<vmem>>, vector<8x128xf32>
      tpu.vector_store %arg4[%c0, %c0_3], %8 {strides = array<i32>} : memref<8x128xf32, #tpu.memory_space<vmem>>, vector<8x128xf32>,
    } else {
    }
    %c1_i32_1 = arith.constant 1 : i32
    %5 = arith.cmpi slt, %1, %c1_i32_1 : i32
    %6 = arith.extui %5 : i1 to i32
    %c0_i32_2 = arith.constant 0 : i32
    %7 = arith.cmpi ne, %6, %c0_i32_2 : i32
    scf.if %7 {
      %c0 = arith.constant 0 : index
      %c0_3 = arith.constant 0 : index
      %8 = vector.load %arg2[%c0, %c0_3] : memref<16x128xf32, #tpu.memory_space<vmem>>, vector<16x128xf32>
      %c0_4 = arith.constant 0 : index
      %c0_5 = arith.constant 0 : index
      %9 = vector.load %arg3[%c0_4, %c0_5] : memref<16x128xf32, #tpu.memory_space<vmem>>, vector<16x128xf32>
      %cst = arith.constant 1.000000e+00 : f32
      %10 = vector.broadcast %cst : f32 to vector<16x128xf32>
      %11 = arith.subf %10, %8 : vector<16x128xf32>
      %cst_6 = arith.constant 9.99999971E-10 : f32
      %12 = vector.broadcast %cst_6 : f32 to vector<16x128xf32>
      %13 = arith.addf %8, %12 : vector<16x128xf32>
      %14 = math.log %13 : vector<16x128xf32>
      %cst_7 = arith.constant 9.99999971E-10 : f32
      %15 = vector.broadcast %cst_7 : f32 to vector<16x128xf32>
      %16 = arith.addf %11, %15 : vector<16x128xf32>
      %17 = math.log %16 : vector<16x128xf32>
      %18 = arith.mulf %11, %11 : vector<16x128xf32>
      %19 = arith.mulf %8, %8 : vector<16x128xf32>
      %cst_8 = arith.constant -2.500000e-01 : f32
      %20 = vector.broadcast %cst_8 : f32 to vector<16x128xf32>
      %21 = arith.mulf %20, %9 : vector<16x128xf32>
      %22 = arith.mulf %21, %18 : vector<16x128xf32>
      %23 = arith.mulf %22, %14 : vector<16x128xf32>
      %cst_9 = arith.constant 1.000000e+00 : f32
      %24 = vector.broadcast %cst_9 : f32 to vector<16x128xf32>
      %25 = arith.subf %24, %9 : vector<16x128xf32>
      %cst_10 = arith.constant -7.500000e-01 : f32
      %26 = vector.broadcast %cst_10 : f32 to vector<16x128xf32>
      %27 = arith.mulf %26, %25 : vector<16x128xf32>
      %28 = arith.mulf %27, %19 : vector<16x128xf32>
      %29 = arith.mulf %28, %17 : vector<16x128xf32>
      %30 = arith.addf %23, %29 : vector<16x128xf32>
      %c0_11 = arith.constant 0 : index
      %c0_12 = arith.constant 0 : index
      %31 = vector.load %arg4[%c0_11, %c0_12] : memref<8x128xf32, #tpu.memory_space<vmem>>, vector<8x128xf32>
      %32 = vector.shape_cast %30 : vector<16x128xf32> to vector<2x8x128xf32>
      %cst_13 = arith.constant dense<0.000000e+00> : vector<8x128xf32>
      %33 = vector.multi_reduction <add>, %32, %cst_13 [0] : vector<2x8x128xf32> to vector<8x128xf32>
      %34 = arith.addf %31, %33 : vector<8x128xf32>
      %c0_14 = arith.constant 0 : index
      %c0_15 = arith.constant 0 : index
      %35 = vector.load %arg4[%c0_14, %c0_15] : memref<8x128xf32, #tpu.memory_space<vmem>>, vector<8x128xf32>
      tpu.vector_store %arg4[%c0_14, %c0_15], %34 {strides = array<i32>} : memref<8x128xf32, #tpu.memory_space<vmem>>, vector<8x128xf32>,
    } else {
    }
    return
  }
  func.func @transform_0(%arg0: i32, %arg1: i32) -> (i32, i32) {
    %c1_i32 = arith.constant 1 : i32
    %0 = arith.muli %arg0, %c1_i32 : i32
    %1 = arith.addi %0, %arg1 : i32
    %c0_i32 = arith.constant 0 : i32
    %2 = arith.minsi %1, %c0_i32 : i32
    %c0_i32_0 = arith.constant 0 : i32
    %c0_i32_1 = arith.constant 0 : i32
    return %2, %c0_i32_0 : i32, i32
  }
  func.func @transform_1(%arg0: i32, %arg1: i32) -> (i32, i32) {
    %c1_i32 = arith.constant 1 : i32
    %0 = arith.muli %arg0, %c1_i32 : i32
    %1 = arith.addi %0, %arg1 : i32
    %c0_i32 = arith.constant 0 : i32
    %2 = arith.minsi %1, %c0_i32 : i32
    %c0_i32_0 = arith.constant 0 : i32
    %c0_i32_1 = arith.constant 0 : i32
    return %2, %c0_i32_0 : i32, i32
  }
  func.func @transform_2(%arg0: i32, %arg1: i32) -> (i32, i32) {
    %c0_i32 = arith.constant 0 : i32
    %c0_i32_0 = arith.constant 0 : i32
    return %arg0, %c0_i32 : i32, i32
  }
}

</mosaic_0001>

<bundles_post_ra>
// kernel: tpu_custom_call.1
= control target key start
LH: loop header
LB: loop body
LE: loop exit
PB: predicated region body
PF: predicated region fallthrough
CT: control target
= control target key end

     0   :  { %7 = vsyncpa [#allocation3], 0  ;;  %s274_s0 = inlined_call_operand.hbm [shape: f32[16,128], index: 0, kind: input, shape index: {}]   ;;  %s275_s1 = inlined_call_operand.hbm [shape: f32[16,128], index: 1, kind: input, shape index: {}]   ;;  %s276_s2 = inlined_call_operand.hbm [shape: f32[8,128], index: 2, kind: output, shape index: {}]  }
   0x1   :  { %8 = vsyncpa [#allocation6], 0 }
   0x2   :  { %9 = vsyncpa [#allocation4], 0  ;;  %s218_s9 = smov [#allocation2]   ;;  %s146_s13 = scalar_lea.hbm %s274_s0, 256 }
   0x3   :  { %s21_s10 = sshll.u32 %s218_s9, 4  ;;  %p147_p0 = scmp.ne.s32.totalorder %s274_s0, %s146_s13  ;;  %s22_s10 = int_to_ptr.vmem [resolvable:$true] %s21_s10 }
   0x4   :  { %p150_p1 = scmp.lt.u32.totalorder %s146_s13, %s274_s0 }
   0x6   :  { %p152_p2 = pnand %p150_p1, %p147_p0 }
   0x8   :  { %155 = shalt.err (!%p152_p2)
}
   0x9   :  { %s156_s18 = scalar_lea.vmem %s22_s10, 256  ;;  %p161_p4 = scmp.lt.s32.totalorder %s22_s10, %s22_s10 }
   0xa   :  { %p157_p3 = scmp.ne.s32.totalorder %s22_s10, %s156_s18  ;;  %p162_p5 = scmp.lt.s32.totalorder %s156_s18, %s156_s18 }
   0xc   :  { %p163_p6 = por %p162_p5, %p161_p4 }
   0xe   :  { %p164_p7 = pnand %p163_p6, %p157_p3 }
  0x10   :  { %167 = shalt.err (!%p164_p7)
}
  0x11   :  { %s219_s19 = smov 128   ;;  %s220_s20 = smov 8  }
  0x12   :  { %27 = dma.hbm_to_vmem [thread:$0]  %s274_s0, 256, %s22_s10, [#allocation3], %s219_s19, %s219_s19, %s220_s20  }
  0x13   :  { %s221_s23 = smov [#allocation5]   ;;  %s168_s27 = scalar_lea.hbm %s275_s1, 256 }
  0x14   :  { %s39_s24 = sshll.u32 %s221_s23, 4  ;;  %p169_p8 = scmp.ne.s32.totalorder %s275_s1, %s168_s27  ;;  %s40_s24 = int_to_ptr.vmem [resolvable:$true] %s39_s24 }
  0x15   :  { %p172_p9 = scmp.lt.u32.totalorder %s168_s27, %s275_s1 }
  0x17   :  { %p174_p10 = pnand %p172_p9, %p169_p8 }
  0x19   :  { %177 = shalt.err (!%p174_p10)
}
  0x1a   :  { %s178_s4 = scalar_lea.vmem %s40_s24, 256  ;;  %p183_p12 = scmp.lt.s32.totalorder %s40_s24, %s40_s24 }
  0x1b   :  { %p179_p11 = scmp.ne.s32.totalorder %s40_s24, %s178_s4  ;;  %p184_p13 = scmp.lt.s32.totalorder %s178_s4, %s178_s4 }
  0x1d   :  { %p185_p0 = por %p184_p13, %p183_p12 }
  0x1f   :  { %p186_p1 = pnand %p185_p0, %p179_p11 }
  0x21   :  { %189 = shalt.err (!%p186_p1)
}
  0x22   :  { %45 = dma.hbm_to_vmem [thread:$0]  %s275_s1, 256, %s40_s24, [#allocation6], %s219_s19, %s219_s19, %s220_s20  }
  0x23   :  { %212 = dma.done.wait [#allocation3], 256  }
  0x24   :  { %213 = vsyncadd [#allocation3], 4294967040 }
  0x25   :  { %214 = dma.done.wait [#allocation6], 256  }
  0x26   :  { %215 = vsyncadd [#allocation6], 4294967040  ;;  %v70_v0 = vld [vmem:[#allocation2] sm:$0xff]  ;;  %v71_v1 = vld [vmem:[#allocation2 + $0x8] sm:$0xff]  ;;  %s222_s1 = smov [#allocation7]  }
  0x27   :  { %v74_v2 = vsub.f32 1.0, %v70_v0  ;;  %v75_v3 = vsub.f32 1.0, %v71_v1  ;;  %v76_v4 = vadd.f32 1e-09, %v70_v0  ;;  %v77_v5 = vadd.f32 1e-09, %v71_v1 }
  0x28   :  { %v72_v6 = vld [vmem:[#allocation5] sm:$0xff]  ;;  %v73_v9 = vld [vmem:[#allocation5 + $0x8] sm:$0xff]  ;;  %v90_v16 = vmul.f32 %v70_v0, %v70_v0  ;;  %v91_v18 = vmul.f32 %v71_v1, %v71_v1  ;;  %s118_s6 = sshll.u32 %s222_s1, 4  ;;  %s119_s6 = int_to_ptr.vmem [resolvable:$true] %s118_s6 }
  0x29   :  { %138 = vlog2.f32 %v76_v4  ;;  %v82_v7 = vadd.f32 1e-09, %v74_v2  ;;  %v83_v8 = vadd.f32 1e-09, %v75_v3  ;;  %v98_v10 = vsub.f32 1.0, %v72_v6  ;;  %s190_s7 = scalar_lea.vmem %s119_s6, 128  ;;  %p195_p3 = scmp.lt.s32.totalorder %s119_s6, %s119_s6 }
  0x2a   :  { %140 = vlog2.f32 %v77_v5  ;;  %v99_v11 = vsub.f32 1.0, %v73_v9  ;;  %v88_v12 = vmul.f32 %v74_v2, %v74_v2  ;;  %v92_v13 = vmul.f32 -0.25, %v72_v6  ;;  %p191_p2 = scmp.ne.s32.totalorder %s119_s6, %s190_s7  ;;  %p196_p4 = scmp.lt.s32.totalorder %s190_s7, %s190_s7 }
  0x2b   :  { %142 = vlog2.f32 %v82_v7  ;;  %v89_v14 = vmul.f32 %v75_v3, %v75_v3  ;;  %v93_v15 = vmul.f32 -0.25, %v73_v9  ;;  %v100_v17 = vmul.f32 -0.75, %v98_v10 }
  0x2c   :  { %144 = vlog2.f32 %v83_v8  ;;  %v101_v19 = vmul.f32 -0.75, %v99_v11  ;;  %v94_v20 = vmul.f32 %v92_v13, %v88_v12  ;;  %p197_p5 = por %p196_p4, %p195_p3 }
  0x2d   :  { %v95_v22 = vmul.f32 %v93_v15, %v89_v14  ;;  %v102_v25 = vmul.f32 %v100_v17, %v90_v16 }
  0x2e   :  { %v103_v28 = vmul.f32 %v101_v19, %v91_v18  ;;  %p198_p6 = pnand %p197_p5, %p191_p2 }
  0x33   :  { %v139_v21 = vpop.eup %138 }
  0x34   :  { %v141_v23 = vpop.eup %140  ;;  %v79_v24 = vmul.f32 0.6931472, %v139_v21 }
  0x35   :  { %v143_v26 = vpop.eup %142  ;;  %v81_v27 = vmul.f32 0.6931472, %v141_v23 }
  0x36   :  { %v145_v29 = vpop.eup %144  ;;  %v85_v30 = vmul.f32 0.6931472, %v143_v26  ;;  %v96_v31 = vmul.f32 %v94_v20, %v79_v24 }
  0x37   :  { %v87_v32 = vmul.f32 0.6931472, %v145_v29  ;;  %v97_v33 = vmul.f32 %v95_v22, %v81_v27 }
  0x38   :  { %v104_v34 = vmul.f32 %v102_v25, %v85_v30 }
  0x39   :  { %v105_v35 = vmul.f32 %v103_v28, %v87_v32 }
  0x3a   :  { %v106_v36 = vadd.f32 %v104_v34, %v96_v31 }
  0x3b   :  { %v107_v37 = vadd.f32 %v105_v35, %v97_v33 }
  0x3d   :  { %v109_v38 = vadd.f32 %v107_v37, %v106_v36 }
  0x3f   :  { %111 = vst [vmem:[#allocation7] sm:$0xff] %v109_v38 }
  0x40   :  { %201 = shalt.err (!%p198_p6)
}
  0x41   :  { %s202_s10 = scalar_lea.hbm %s276_s2, 128 }
  0x42   :  { %p203_p7 = scmp.ne.s32.totalorder %s276_s2, %s202_s10  ;;  %p206_p8 = scmp.lt.u32.totalorder %s202_s10, %s276_s2 }
  0x44   :  { %p208_p9 = pnand %p206_p8, %p203_p7 }
  0x46   :  { %211 = shalt.err (!%p208_p9)
}
  0x47   :  { %121 = dma.vmem_to_hbm [thread:$0]  %s119_s6, 128, %s276_s2, [#allocation4]  }
  0x48   :  { %216 = dma.done.wait [#allocation4], 128  }
  0x49   :  { %217 = vsyncadd [#allocation4], 4294967168 }
  0x4a   :  { %125 = vsyncpa [#allocation3], 1 }
  0x4b   :  { %126 = vsyncpa [#allocation6], 1 }
  0x4c   :  { %127 = vsyncpa [#allocation4], 1 }

</bundles_post_ra>
